<compile_context>
chip_gen: v5e
topology: v5e:2x2
jax: 0.10.0
libtpu: 0.0.40
codegen_flags: <defaults>
</compile_context>

<pallas_src>
import functools

import jax
import jax.numpy as jnp
from jax.experimental import pallas as pl
from jax.experimental.pallas import tpu as pltpu

HIDDEN1 = 50
HIDDEN2 = 20
LEAKY_SLOPE = 0.01          # nn.LeakyReLU default
LANE = 128
SUBLANE = 8

# A @ B^T : contract the last axis of both operands (z stays batch-major).
_TRANS_B_DIMS = (((1,), (1,)), ((), ()))


def _leaky_relu(x):
    return jnp.where(x >= 0, x, LEAKY_SLOPE * x)


def _softplus(x):
    # torch.nn.functional.softplus (beta=1, threshold=20); min() guards the
    # exp in the untaken branch.
    return jnp.where(x > 20.0, x, jnp.log1p(jnp.exp(jnp.minimum(x, 20.0))))


def _flexible_var_kernel(z_ref, w1_ref, b1_ref, w2_ref, b2_ref, w3_ref, b3_ref,
                         o_ref):
    # Activations are (features, block_b): features on sublanes, batch on
    # lanes.  Feature widths (56/24/8) are tiny, so VPU/EUP work per batch
    # element is minimal and the output store is lane-dense and un-padded.
    z = z_ref[...].astype(jnp.float32)                      # (block_b, D)

    # h1 = W1 @ z^T : contract the feature axis of both operands on the MXU.
    h1 = jax.lax.dot_general(w1_ref[...], z, _TRANS_B_DIMS,
                             preferred_element_type=jnp.float32)
    h1 = _leaky_relu(h1 + b1_ref[...])                      # (h1p, block_b)

    h2 = jnp.dot(w2_ref[...], h1, preferred_element_type=jnp.float32)
    h2 = _leaky_relu(h2 + b2_ref[...])                      # (h2p, block_b)

    h3 = jnp.dot(w3_ref[...], h2, preferred_element_type=jnp.float32)
    h3 = h3 + b3_ref[...]                                   # (outp, block_b)

    out = _softplus(h3) + 0.001
    o_ref[...] = out[:o_ref.shape[0], :].astype(o_ref.dtype)


def _round_up(x, m):
    return ((x + m - 1) // m) * m


def _device_config():
    """(tensorcores sharing the grid, scoped vmem limit, hard block cap)."""
    cores, vmem_limit, hard_cap = 1, 32 * 1024 * 1024, 4096   # safe defaults
    try:
        kind = jax.devices()[0].device_kind.lower()
    except Exception:
        return cores, vmem_limit, hard_cap
    if "v7" in kind:
        cores, vmem_limit, hard_cap = 2, 32 * 1024 * 1024, 4096   # 64 MiB/TC
    elif "v5" in kind or "v6" in kind:
        cores, vmem_limit, hard_cap = 1, 64 * 1024 * 1024, 8192   # 128 MiB
    return cores, vmem_limit, hard_cap


def _choose_block_b(B, D, out_dim, h1p, h2p, outp, cores, vmem_limit, cap):
    # Budget: double-buffered z + out tiles plus the (feat, block_b) f32
    # intermediates, against half the scoped VMEM limit (headroom for the
    # resident weights and compiler temporaries).
    per_col = 4 * (2 * D + 2 * out_dim + h1p + h2p + outp)
    budget_cap = max(((vmem_limit // 2) // per_col) // LANE * LANE, LANE)
    cap = min(budget_cap, cap)
    blk = min(_round_up(pl.cdiv(B, max(cores, 1)), LANE), cap)
    # A full-array block is always legal and avoids padded edge lanes.
    return B if blk >= B else blk


@functools.partial(jax.jit,
                   static_argnames=("out_dim", "block_b", "vmem_limit"))
def _forward(z, padded_params, *, out_dim, block_b, vmem_limit):
    w1p, b1p, w2p, b2p, w3p, b3p = padded_params
    B, D = z.shape
    grid = (pl.cdiv(B, block_b),)

    # Weights/biases are tiny and constant across the grid -> full tensors
    # with a constant index_map (stay resident in VMEM).
    def full(arr):
        return pl.BlockSpec(arr.shape, lambda i: (0,) * arr.ndim)

    flops = 2 * B * (D * HIDDEN1 + HIDDEN1 * HIDDEN2 + HIDDEN2 * out_dim)
    bytes_accessed = 4 * (B * (D + out_dim)
                          + sum(p.size for p in padded_params))
    cost = pl.CostEstimate(flops=flops, transcendentals=2 * B * out_dim,
                           bytes_accessed=bytes_accessed)

    out_t = pl.pallas_call(
        _flexible_var_kernel,
        out_shape=jax.ShapeDtypeStruct((out_dim, B), jnp.float32),
        grid_spec=pltpu.PrefetchScalarGridSpec(
            num_scalar_prefetch=0,
            grid=grid,
            in_specs=[
                pl.BlockSpec((block_b, D), lambda i: (i, 0)),   # z tile
                full(w1p), full(b1p),
                full(w2p), full(b2p),
                full(w3p), full(b3p),
            ],
            out_specs=pl.BlockSpec((out_dim, block_b), lambda i: (0, i)),
        ),
        compiler_params=pltpu.CompilerParams(
            dimension_semantics=("parallel",),
            vmem_limit_bytes=vmem_limit),
        cost_estimate=cost,
    )(z, w1p, b1p, w2p, b2p, w3p, b3p)

    # (out_dim, B) -> (B, out_dim): one tiny fused transpose of the un-padded
    # result instead of a 128-lane padded writeback plus slice re-read.
    return out_t.T


def prepare_params(params):
    """Pad/cast the six PyTorch-native tensors once, outside the hot path.

    params: (w1 (50, in), b1 (50,), w2 (20, 50), b2 (20,), w3 (out, 20),
             b3 (out,)) in the nn.Linear (out_features, in_features) layout.
    Zero padding is mathematically inert (padded rows/cols only touch
    padded features, which are sliced away inside the kernel).
    """
    w1, b1, w2, b2, w3, b3 = params
    in_dim = w1.shape[1]
    out_dim = w3.shape[0]
    h1p = _round_up(HIDDEN1, SUBLANE)      # 56
    h2p = _round_up(HIDDEN2, SUBLANE)      # 24
    outp = _round_up(out_dim, SUBLANE)     # 8 for out_dim=4

    def pad2(x, shape):
        x = jnp.asarray(x, jnp.float32)
        return jnp.pad(x, [(0, t - s) for s, t in zip(x.shape, shape)])

    w1p = pad2(w1, (h1p, in_dim))
    b1p = pad2(jnp.asarray(b1, jnp.float32).reshape(-1, 1), (h1p, 1))
    w2p = pad2(w2, (h2p, h1p))
    b2p = pad2(jnp.asarray(b2, jnp.float32).reshape(-1, 1), (h2p, 1))
    w3p = pad2(w3, (outp, h2p))
    b3p = pad2(jnp.asarray(b3, jnp.float32).reshape(-1, 1), (outp, 1))
    return (w1p, b1p, w2p, b2p, w3p, b3p), out_dim


def flexible_var_network(z, prepared):
    """z: (B, input_dim).  prepared: prepare_params(...).  -> (B, output_dim)."""
    padded_params, out_dim = prepared
    B, D = z.shape
    h1p = padded_params[0].shape[0]
    h2p = padded_params[2].shape[0]
    outp = padded_params[4].shape[0]
    cores, vmem_limit, hard_cap = _device_config()
    block_b = _choose_block_b(B, D, out_dim, h1p, h2p, outp,
                              cores, vmem_limit, hard_cap)
    return _forward(z, padded_params, out_dim=out_dim,
                    block_b=block_b, vmem_limit=vmem_limit)


def init_params(key, input_dim, output_dim):
    """PyTorch-default nn.Linear init (uniform +-1/sqrt(fan_in)), stored
    PyTorch-native as (out_features, in_features)."""
    def linear(k, fan_in, fan_out):
        kw, kb = jax.random.split(k)
        bound = 1.0 / jnp.sqrt(fan_in)
        w = jax.random.uniform(kw, (fan_out, fan_in), jnp.float32, -bound, bound)
        b = jax.random.uniform(kb, (fan_out,), jnp.float32, -bound, bound)
        return w, b

    k1, k2, k3 = jax.random.split(key, 3)
    w1, b1 = linear(k1, input_dim, HIDDEN1)
    w2, b2 = linear(k2, HIDDEN1, HIDDEN2)
    w3, b3 = linear(k3, HIDDEN2, output_dim)
    return (w1, b1, w2, b2, w3, b3)


def reference(z, params):
    w1, b1, w2, b2, w3, b3 = params
    h = _leaky_relu(z @ w1.T + b1)
    h = _leaky_relu(h @ w2.T + b2)
    h = h @ w3.T + b3
    return _softplus(h) + 0.001


if __name__ == "__main__":
    key = jax.random.PRNGKey(0)
    k_param, k_z = jax.random.split(key)

    batch, input_dim, output_dim = 128, 16, 4
    params = init_params(k_param, input_dim, output_dim)
    prepared = prepare_params(params)            # one-time pad/cast
    z = jax.random.normal(k_z, (batch, input_dim), dtype=jnp.float32)

    out = jax.block_until_ready(flexible_var_network(z, prepared))
    ref = reference(z, params)
    assert out.shape == (batch, output_dim), out.shape
    assert jnp.allclose(out, ref, atol=1e-5, rtol=1e-5), (
        float(jnp.max(jnp.abs(out - ref))))

    # Batch that is not lane-aligned: block_b == B (full-dim block, no padding).
    z2 = jax.random.normal(k_z, (100, input_dim), dtype=jnp.float32)
    out2 = jax.block_until_ready(flexible_var_network(z2, prepared))
    assert out2.shape == (100, output_dim), out2.shape
    assert jnp.allclose(out2, reference(z2, params), atol=1e-5, rtol=1e-5)

    print("KERNEL_OK")
</pallas_src>

<mosaic_0001>
module attributes {stable_mosaic.version = 11 : i64} {
  func.func @_flexible_var_kernel(%arg0: i32, %arg1: memref<128x16xf32, #tpu.memory_space<vmem>>, %arg2: memref<56x16xf32, #tpu.memory_space<vmem>>, %arg3: memref<56x1xf32, #tpu.memory_space<vmem>>, %arg4: memref<24x56xf32, #tpu.memory_space<vmem>>, %arg5: memref<24x1xf32, #tpu.memory_space<vmem>>, %arg6: memref<8x24xf32, #tpu.memory_space<vmem>>, %arg7: memref<8x1xf32, #tpu.memory_space<vmem>>, %arg8: memref<4x128xf32, #tpu.memory_space<vmem>>) attributes {dimension_semantics = [#tpu.dimension_semantics<parallel>], iteration_bounds = array<i64: 1>, scalar_prefetch = 0 : i64, scratch_operands = 0 : i64, tpu.core_type = #tpu.core_type<tc>, window_params = [{transform_indices = @transform_0, window_bounds = array<i64: 128, 16>}, {pipeline_mode = #tpu.pipeline_mode<synchronous>, transform_indices = @transform_1, window_bounds = array<i64: 56, 16>}, {pipeline_mode = #tpu.pipeline_mode<synchronous>, transform_indices = @transform_2, window_bounds = array<i64: 56, 1>}, {pipeline_mode = #tpu.pipeline_mode<synchronous>, transform_indices = @transform_3, window_bounds = array<i64: 24, 56>}, {pipeline_mode = #tpu.pipeline_mode<synchronous>, transform_indices = @transform_4, window_bounds = array<i64: 24, 1>}, {pipeline_mode = #tpu.pipeline_mode<synchronous>, transform_indices = @transform_5, window_bounds = array<i64: 8, 24>}, {pipeline_mode = #tpu.pipeline_mode<synchronous>, transform_indices = @transform_6, window_bounds = array<i64: 8, 1>}, {transform_indices = @transform_7, window_bounds = array<i64: 4, 128>}]} {
    %c0 = arith.constant 0 : index
    %c0_0 = arith.constant 0 : index
    %0 = vector.load %arg1[%c0, %c0_0] : memref<128x16xf32, #tpu.memory_space<vmem>>, vector<128x16xf32>
    %c0_1 = arith.constant 0 : index
    %c0_2 = arith.constant 0 : index
    %1 = vector.load %arg2[%c0_1, %c0_2] : memref<56x16xf32, #tpu.memory_space<vmem>>, vector<56x16xf32>
    %cst = arith.constant dense<0.000000e+00> : vector<56x128xf32>
    %2 = tpu.matmul %1, %0, %cst {dimension_numbers = #tpu.dot_dimension_numbers<[1], [1], [0], [0], [0, 0, 1, 0], [], []>} : vector<56x16xf32>, vector<128x16xf32>, vector<56x128xf32> -> vector<56x128xf32>
    %c0_3 = arith.constant 0 : index
    %c0_4 = arith.constant 0 : index
    %3 = vector.load %arg3[%c0_3, %c0_4] : memref<56x1xf32, #tpu.memory_space<vmem>>, vector<56x1xf32>
    %4 = vector.broadcast %3 : vector<56x1xf32> to vector<56x128xf32>
    %5 = arith.addf %2, %4 : vector<56x128xf32>
    %cst_5 = arith.constant 0.000000e+00 : f32
    %6 = vector.broadcast %cst_5 : f32 to vector<56x128xf32>
    %7 = arith.cmpf oge, %5, %6 : vector<56x128xf32>
    %cst_6 = arith.constant 0.00999999977 : f32
    %8 = vector.broadcast %cst_6 : f32 to vector<56x128xf32>
    %9 = arith.mulf %8, %5 : vector<56x128xf32>
    %10 = arith.select %7, %5, %9 : vector<56x128xi1>, vector<56x128xf32>
    %c0_7 = arith.constant 0 : index
    %c0_8 = arith.constant 0 : index
    %11 = vector.load %arg4[%c0_7, %c0_8] : memref<24x56xf32, #tpu.memory_space<vmem>>, vector<24x56xf32>
    %cst_9 = arith.constant dense<0.000000e+00> : vector<24x128xf32>
    %12 = tpu.matmul %11, %10, %cst_9 {dimension_numbers = #tpu.dot_dimension_numbers<[1], [0], [0], [1], [0, 0, 1, 1], [], []>} : vector<24x56xf32>, vector<56x128xf32>, vector<24x128xf32> -> vector<24x128xf32>
    %c0_10 = arith.constant 0 : index
    %c0_11 = arith.constant 0 : index
    %13 = vector.load %arg5[%c0_10, %c0_11] : memref<24x1xf32, #tpu.memory_space<vmem>>, vector<24x1xf32>
    %14 = vector.broadcast %13 : vector<24x1xf32> to vector<24x128xf32>
    %15 = arith.addf %12, %14 : vector<24x128xf32>
    %cst_12 = arith.constant 0.000000e+00 : f32
    %16 = vector.broadcast %cst_12 : f32 to vector<24x128xf32>
    %17 = arith.cmpf oge, %15, %16 : vector<24x128xf32>
    %cst_13 = arith.constant 0.00999999977 : f32
    %18 = vector.broadcast %cst_13 : f32 to vector<24x128xf32>
    %19 = arith.mulf %18, %15 : vector<24x128xf32>
    %20 = arith.select %17, %15, %19 : vector<24x128xi1>, vector<24x128xf32>
    %c0_14 = arith.constant 0 : index
    %c0_15 = arith.constant 0 : index
    %21 = vector.load %arg6[%c0_14, %c0_15] : memref<8x24xf32, #tpu.memory_space<vmem>>, vector<8x24xf32>
    %cst_16 = arith.constant dense<0.000000e+00> : vector<8x128xf32>
    %22 = tpu.matmul %21, %20, %cst_16 {dimension_numbers = #tpu.dot_dimension_numbers<[1], [0], [0], [1], [0, 0, 1, 1], [], []>} : vector<8x24xf32>, vector<24x128xf32>, vector<8x128xf32> -> vector<8x128xf32>
    %c0_17 = arith.constant 0 : index
    %c0_18 = arith.constant 0 : index
    %23 = vector.load %arg7[%c0_17, %c0_18] : memref<8x1xf32, #tpu.memory_space<vmem>>, vector<8x1xf32>
    %24 = vector.broadcast %23 : vector<8x1xf32> to vector<8x128xf32>
    %25 = arith.addf %22, %24 : vector<8x128xf32>
    %cst_19 = arith.constant 2.000000e+01 : f32
    %26 = vector.broadcast %cst_19 : f32 to vector<8x128xf32>
    %27 = arith.cmpf ogt, %25, %26 : vector<8x128xf32>
    %cst_20 = arith.constant 2.000000e+01 : f32
    %28 = vector.broadcast %cst_20 : f32 to vector<8x128xf32>
    %29 = arith.minimumf %25, %28 : vector<8x128xf32>
    %30 = math.exp %29 : vector<8x128xf32>
    %31 = math.log1p %30 : vector<8x128xf32>
    %32 = arith.select %27, %25, %31 : vector<8x128xi1>, vector<8x128xf32>
    %cst_21 = arith.constant 1.000000e-03 : f32
    %33 = vector.broadcast %cst_21 : f32 to vector<8x128xf32>
    %34 = arith.addf %32, %33 : vector<8x128xf32>
    %35 = vector.extract_strided_slice %34 {offsets = [0, 0], sizes = [4, 128], strides = [1, 1]} : vector<8x128xf32> to vector<4x128xf32>
    %c0_22 = arith.constant 0 : index
    %c0_23 = arith.constant 0 : index
    %36 = vector.load %arg8[%c0_22, %c0_23] : memref<4x128xf32, #tpu.memory_space<vmem>>, vector<4x128xf32>
    tpu.vector_store %arg8[%c0_22, %c0_23], %35 {strides = array<i32>} : memref<4x128xf32, #tpu.memory_space<vmem>>, vector<4x128xf32>,
    return
  }
  func.func @transform_0(%arg0: i32) -> (i32, i32) {
    %c0_i32 = arith.constant 0 : i32
    %c0_i32_0 = arith.constant 0 : i32
    return %arg0, %c0_i32 : i32, i32
  }
  func.func @transform_1(%arg0: i32) -> (i32, i32) {
    %c0_i32 = arith.constant 0 : i32
    %c0_i32_0 = arith.constant 0 : i32
    %c0_i32_1 = arith.constant 0 : i32
    return %c0_i32, %c0_i32_0 : i32, i32
  }
  func.func @transform_2(%arg0: i32) -> (i32, i32) {
    %c0_i32 = arith.constant 0 : i32
    %c0_i32_0 = arith.constant 0 : i32
    %c0_i32_1 = arith.constant 0 : i32
    return %c0_i32, %c0_i32_0 : i32, i32
  }
  func.func @transform_3(%arg0: i32) -> (i32, i32) {
    %c0_i32 = arith.constant 0 : i32
    %c0_i32_0 = arith.constant 0 : i32
    %c0_i32_1 = arith.constant 0 : i32
    return %c0_i32, %c0_i32_0 : i32, i32
  }
  func.func @transform_4(%arg0: i32) -> (i32, i32) {
    %c0_i32 = arith.constant 0 : i32
    %c0_i32_0 = arith.constant 0 : i32
    %c0_i32_1 = arith.constant 0 : i32
    return %c0_i32, %c0_i32_0 : i32, i32
  }
  func.func @transform_5(%arg0: i32) -> (i32, i32) {
    %c0_i32 = arith.constant 0 : i32
    %c0_i32_0 = arith.constant 0 : i32
    %c0_i32_1 = arith.constant 0 : i32
    return %c0_i32, %c0_i32_0 : i32, i32
  }
  func.func @transform_6(%arg0: i32) -> (i32, i32) {
    %c0_i32 = arith.constant 0 : i32
    %c0_i32_0 = arith.constant 0 : i32
    %c0_i32_1 = arith.constant 0 : i32
    return %c0_i32, %c0_i32_0 : i32, i32
  }
  func.func @transform_7(%arg0: i32) -> (i32, i32) {
    %c0_i32 = arith.constant 0 : i32
    %c0_i32_0 = arith.constant 0 : i32
    return %c0_i32, %arg0 : i32, i32
  }
}

</mosaic_0001>

<bundles_post_ra>
// kernel: _forward.1
= control target key start
LH: loop header
LB: loop body
LE: loop exit
PB: predicated region body
PF: predicated region fallthrough
CT: control target
= control target key end

     0   :  { %vm92_vm0 = vcmask 130048   ;;  %s658_s0 = inlined_call_operand.vmem [shape: f32[128,16], index: 0, kind: input, shape index: {}]   ;;  %s659_s1 = inlined_call_operand.vmem [shape: f32[56,16], index: 1, kind: input, shape index: {}]   ;;  %s660_s2 = inlined_call_operand.vmem [shape: f32[56,1], index: 2, kind: input, shape index: {}]   ;;  %s661_s3 = inlined_call_operand.vmem [shape: f32[24,56], index: 3, kind: input, shape index: {}]   ;;  %s662_s4 = inlined_call_operand.vmem [shape: f32[24,1], index: 4, kind: input, shape index: {}]   ;;  %s663_s5 = inlined_call_operand.vmem [shape: f32[8,24], index: 5, kind: input, shape index: {}]   ;;  %s664_s6 = inlined_call_operand.vmem [shape: f32[8,1], index: 6, kind: input, shape index: {}]   ;;  %s665_s7 = inlined_call_operand.hbm [shape: f32[4,128], index: 7, kind: output, shape index: {}]  }
   0x1   :  { %v42_v0 = vld [vmem:[%s658_s0 + $0x78] sm:$0xff]  ;;  %v41_v1 = vld [vmem:[%s658_s0 + $0x70] sm:$0xff] }
   0x2   :  { %377 = vmatpush.xpose.msk.msra.mxu2 %vm92_vm0, %v42_v0  ;;  %378 = vmatpush.xpose.msk.msra.mxu3 %vm92_vm0, %v42_v0 }
   0x3   :  { %350 = vmatpush.xpose.msk.msra.mxu0 %vm92_vm0, %v42_v0 }
   0x4   :  { %12 = vsyncpa [#allocation3], 0  ;;  %v40_v2 = vld [vmem:[%s658_s0 + $0x68] sm:$0xff]  ;;  %v39_v3 = vld [vmem:[%s658_s0 + $0x60] sm:$0xff]  ;;  %v444_v11 = vmov 0   ;;  %vm242_vm8 = vcmask 457728  }
   0x5   :  { %v38_v4 = vld [vmem:[%s658_s0 + $0x58] sm:$0xff]  ;;  %v37_v5 = vld [vmem:[%s658_s0 + $0x50] sm:$0xff]  ;;  %v36_v6 = vld [vmem:[%s658_s0 + $0x48] sm:$0xff]  ;;  %411 = vset.pattern.permute.xlu0 %v444_v11  ;;  %412 = vset.pattern.permute.xlu1 %v444_v11  ;;  %vm294_vm12 = vcmask 195584   ;;  %s341_s28 = sshll.u32 %s665_s7, 4  ;;  %s342_s28 = int_to_ptr.hbm [resolvable:$true] %s341_s28 }
   0x6   :  { %379 = vmatpush.xpose.msk.msra.mxu2 %vm92_vm0, %v41_v1  ;;  %380 = vmatpush.xpose.msk.msra.mxu3 %vm92_vm0, %v41_v1  ;;  %v35_v7 = vld [vmem:[%s658_s0 + $0x40] sm:$0xff]  ;;  %v34_v8 = vld [vmem:[%s658_s0 + $0x38] sm:$0xff]  ;;  %v56_v9 = vld [vmem:[%s660_s2 + $0x30] sm:$0xff] }
   0x7   :  { %351 = vmatpush.xpose.msk.msra.mxu0 %vm92_vm0, %v41_v1  ;;  %v33_v10 = vld [vmem:[%s658_s0 + $0x30] sm:$0xff]  ;;  %89 = vperm.xlu0 %411, %v56_v9   ;;  %v32_v12 = vld [vmem:[%s658_s0 + $0x28] sm:$0xff]  ;;  %v54_v13 = vld [vmem:[%s660_s2 + $0x20] sm:$0xff] }
   0x8   :  { %413 = vset.pattern.permute.xlu2 %v444_v11  ;;  %v55_v14 = vld [vmem:[%s660_s2 + $0x28] sm:$0xff]  ;;  %v31_v15 = vld [vmem:[%s658_s0 + $0x20] sm:$0xff]  ;;  %79 = vperm.xlu1 %412, %v54_v13   ;;  %v30_v16 = vld [vmem:[%s658_s0 + $0x18] sm:$0xff] }
   0x9   :  { %v53_v17 = vld [vmem:[%s660_s2 + $0x18] sm:$0xff]  ;;  %v50_v18 = vld [vmem:[%s660_s2] sm:$0xff]  ;;  %v29_v19 = vld [vmem:[%s658_s0 + $0x10] sm:$0xff] }
   0xa   :  { %381 = vmatpush.xpose.msk.msra.mxu2 %vm92_vm0, %v40_v2  ;;  %382 = vmatpush.xpose.msk.msra.mxu3 %vm92_vm0, %v40_v2  ;;  %v28_v20 = vld [vmem:[%s658_s0 + $0x8] sm:$0xff]  ;;  %v226_v21 = vld [vmem:[%s662_s4 + $0x10] sm:$0xff]  ;;  %v224_v22 = vld [vmem:[%s662_s4] sm:$0xff] }
   0xb   :  { %352 = vmatpush.xpose.msk.msra.mxu0 %vm92_vm0, %v40_v2  ;;  %v52_v23 = vld [vmem:[%s660_s2 + $0x10] sm:$0xff]  ;;  %v27_v24 = vld [vmem:[%s658_s0] sm:$0xff]  ;;  %v44_v25 = vld [vmem:[%s659_s1 + $0x8] sm:$0xff] }
   0xc   :  { %69 = vperm.xlu2 %413, %v52_v23   ;;  %v48_v26 = vld [vmem:[%s659_s1 + $0x28] sm:$0xff]  ;;  %v43_v27 = vld [vmem:[%s659_s1] sm:$0xff]  ;;  %v45_v30 = vld [vmem:[%s659_s1 + $0x10] sm:$0xff] }
   0xd   :  { %v288_v28 = vld [vmem:[%s664_s6] sm:$0xff]  ;;  %v51_v29 = vld [vmem:[%s660_s2 + $0x8] sm:$0xff]  ;;  %v49_v31 = vld [vmem:[%s659_s1 + $0x30] sm:$0xff] }
   0xe   :  { %383 = vmatpush.xpose.msk.msra.mxu2 %vm92_vm0, %v39_v3  ;;  %384 = vmatpush.xpose.msk.msra.mxu3 %vm92_vm0, %v39_v3  ;;  %v225_v32 = vld [vmem:[%s662_s4 + $0x8] sm:$0xff]  ;;  %v46_v33 = vld [vmem:[%s659_s1 + $0x18] sm:$0xff]  ;;  %v47_v34 = vld [vmem:[%s659_s1 + $0x20] sm:$0xff] }
   0xf   :  { %353 = vmatpush.xpose.msk.msra.mxu0 %vm92_vm0, %v39_v3  ;;  %84 = vperm.xlu0 %411, %v55_v14   ;;  %v287_v23 = vld [vmem:[%s663_s5] sm:$0xff]  ;;  %s445_s5 = smov [#allocation2]  }
  0x10   :  { %74 = vperm.xlu1 %412, %v53_v17   ;;  %s339_s25 = sshll.u32 %s445_s5, 4  ;;  %s340_s25 = int_to_ptr.vmem [resolvable:$true] %s339_s25 }
  0x12   :  { %385 = vmatpush.xpose.msk.msra.mxu2 %vm92_vm0, %v38_v4  ;;  %386 = vmatpush.xpose.msk.msra.mxu3 %vm92_vm0, %v38_v4 }
  0x13   :  { %354 = vmatpush.xpose.msk.msra.mxu0 %vm92_vm0, %v38_v4 }
  0x14   :  { %64 = vperm.xlu2 %413, %v51_v29  }
  0x16   :  { %387 = vmatpush.xpose.msk.msra.mxu2 %vm92_vm0, %v37_v5  ;;  %388 = vmatpush.xpose.msk.msra.mxu3 %vm92_vm0, %v37_v5 }
  0x17   :  { %355 = vmatpush.xpose.msk.msra.mxu0 %vm92_vm0, %v37_v5  ;;  %59 = vperm.xlu0 %411, %v50_v18   ;;  %v221_v5 = vld [vmem:[%s661_s3] sm:$0xff] }
  0x18   :  { %239 = vperm.xlu1 %412, %v226_v21  }
  0x1a   :  { %389 = vmatpush.xpose.msk.msra.mxu2 %vm92_vm0, %v36_v6  ;;  %390 = vmatpush.xpose.msk.msra.mxu3 %vm92_vm0, %v36_v6 }
  0x1b   :  { %356 = vmatpush.xpose.msk.msra.mxu0 %vm92_vm0, %v36_v6 }
  0x1c   :  { %234 = vperm.xlu2 %413, %v225_v32  }
  0x1e   :  { %391 = vmatpush.xpose.msk.msra.mxu2 %vm92_vm0, %v35_v7  ;;  %392 = vmatpush.xpose.msk.msra.mxu3 %vm92_vm0, %v35_v7 }
  0x1f   :  { %357 = vmatpush.xpose.msk.msra.mxu0 %vm92_vm0, %v35_v7  ;;  %229 = vperm.xlu0 %411, %v224_v22   ;;  %v222_v7 = vld [vmem:[%s661_s3 + $0x8] sm:$0xff] }
  0x20   :  { %291 = vperm.xlu1 %412, %v288_v28  }
  0x22   :  { %393 = vmatpush.xpose.msk.msra.mxu2 %vm92_vm0, %v34_v8  ;;  %394 = vmatpush.xpose.msk.msra.mxu3 %vm92_vm0, %v34_v8 }
  0x23   :  { %358 = vmatpush.xpose.msk.msra.mxu0 %vm92_vm0, %v34_v8  ;;  %v223_v8 = vld [vmem:[%s661_s3 + $0x10] sm:$0xff] }
  0x26   :  { %395 = vmatpush.xpose.msk.msra.mxu2 %vm92_vm0, %v33_v10  ;;  %396 = vmatpush.xpose.msk.msra.mxu3 %vm92_vm0, %v33_v10 }
  0x27   :  { %359 = vmatpush.xpose.msk.msra.mxu0 %vm92_vm0, %v33_v10 }
  0x2a   :  { %397 = vmatpush.xpose.msk.msra.mxu2 %vm92_vm0, %v32_v12  ;;  %398 = vmatpush.xpose.msk.msra.mxu3 %vm92_vm0, %v32_v12 }
  0x2b   :  { %360 = vmatpush.xpose.msk.msra.mxu0 %vm92_vm0, %v32_v12 }
  0x2e   :  { %399 = vmatpush.xpose.msk.msra.mxu2 %vm92_vm0, %v31_v15  ;;  %400 = vmatpush.xpose.msk.msra.mxu3 %vm92_vm0, %v31_v15 }
  0x2f   :  { %361 = vmatpush.xpose.msk.msra.mxu0 %vm92_vm0, %v31_v15 }
  0x32   :  { %401 = vmatpush.xpose.msk.msra.mxu2 %vm92_vm0, %v30_v16  ;;  %402 = vmatpush.xpose.msk.msra.mxu3 %vm92_vm0, %v30_v16 }
  0x33   :  { %362 = vmatpush.xpose.msk.msra.mxu0 %vm92_vm0, %v30_v16 }
  0x36   :  { %403 = vmatpush.xpose.msk.msra.mxu2 %vm92_vm0, %v29_v19  ;;  %404 = vmatpush.xpose.msk.msra.mxu3 %vm92_vm0, %v29_v19 }
  0x37   :  { %363 = vmatpush.xpose.msk.msra.mxu0 %vm92_vm0, %v29_v19 }
  0x3a   :  { %405 = vmatpush.xpose.msk.msra.mxu2 %vm92_vm0, %v28_v20  ;;  %406 = vmatpush.xpose.msk.msra.mxu3 %vm92_vm0, %v28_v20 }
  0x3b   :  { %364 = vmatpush.xpose.msk.msra.mxu0 %vm92_vm0, %v28_v20 }
  0x3e   :  { %407 = vmatpush.xpose.msk.msra.mxu2 %vm92_vm0, %v27_v24  ;;  %408 = vmatpush.xpose.msk.msra.mxu3 %vm92_vm0, %v27_v24 }
  0x3f   :  { %365 = vmatpush.xpose.msk.msra.mxu0 %vm92_vm0, %v27_v24 }
  0x41   :  { %367 = vmatmul.msk.f32.vlgmr.msra.gmra.mxu2 %vm92_vm0, %v44_v25  ;;  %371 = vmatmul.msk.f32.vlgmr.msra.gmra.mxu3 %vm92_vm0, %v48_v26 }
  0x42   :  { %366 = vmatmul.msk.f32.vlgmr.msra.gmra.mxu0 %vm92_vm0, %v43_v27 }
  0x49   :  { %368 = vmatmul.msk.f32.gmra.mxu2 %vm92_vm0, %v45_v30  ;;  %372 = vmatmul.msk.f32.gmra.mxu3 %vm92_vm0, %v49_v31 }
  0x51   :  { %369 = vmatmul.msk.f32.gmra.mxu2 %vm92_vm0, %v46_v33 }
  0x59   :  { %370 = vmatmul.msk.f32.gmra.mxu2 %vm92_vm0, %v47_v34 }
  0x66   :  { %v70_v48 = vpop.permute.xlu2 %69 }
  0x6e   :  { %v65_v52 = vpop.permute.xlu2 %64 }
  0x76   :  { %v235_v11 = vpop.permute.xlu2 %234 }
  0x79   :  { %v90_v35 = vpop.permute.xlu0 %89 }
  0x7a   :  { %v80_v45 = vpop.permute.xlu1 %79 }
  0x81   :  { %v85_v38 = vpop.permute.xlu0 %84 }
  0x82   :  { %v75_v50 = vpop.permute.xlu1 %74 }
  0x89   :  { %v60_v60 = vpop.permute.xlu0 %59 }
  0x8a   :  { %v240_v12 = vpop.permute.xlu1 %239 }
  0x91   :  { %v230_v14 = vpop.permute.xlu0 %229 }
  0x92   :  { %v292_v25 = vpop.permute.xlu1 %291 }
  0xbf   :  { %v179_v56 = vpop.f32.mrf.mxu0 }
  0xc0   :  { %v180_v61 = vadd.f32 %v179_v56, %v60_v60 }
  0xc2   :  { %v207_v3 = vmul.f32 0.01, %v180_v61  ;;  %vm200_vm7 = vcmp.ge.f32.partialorder %v180_v61, 0.0 }
  0xc4   :  { %v182_v36 = vpop.f32.mrf.mxu2  ;;  %v194_v37 = vpop.f32.mrf.mxu3  ;;  %v214_v6 = vsel %vm200_vm7, %v180_v61, %v207_v3 }
  0xc5   :  { %v195_v39 = vadd.f32 %v194_v37, %v85_v38  ;;  %v183_v57 = vadd.f32 %v182_v36, %v65_v52 }
  0xc7   :  { %v212_v43 = vmul.f32 0.01, %v195_v39  ;;  %vm205_vm1 = vcmp.ge.f32.partialorder %v195_v39, 0.0  ;;  %v208_v1 = vmul.f32 0.01, %v183_v57  ;;  %vm201_vm6 = vcmp.ge.f32.partialorder %v183_v57, 0.0 }
  0xc9   :  { %v219_v47 = vsel %vm205_vm1, %v195_v39, %v212_v43  ;;  %v215_v4 = vsel %vm201_vm6, %v183_v57, %v208_v1 }
  0xcc   :  { %v185_v40 = vpop.f32.mrf.mxu2  ;;  %v197_v41 = vpop.f32.mrf.mxu3 }
  0xcd   :  { %v198_v42 = vadd.f32 %v197_v41, %v90_v35  ;;  %v186_v54 = vadd.f32 %v185_v40, %v70_v48 }
  0xcf   :  { %vm206_vm2 = vcmp.ge.f32.partialorder %v198_v42, 0.0  ;;  %v213_v44 = vmul.f32 0.01, %v198_v42  ;;  %v209_v63 = vmul.f32 0.01, %v186_v54  ;;  %vm202_vm5 = vcmp.ge.f32.partialorder %v186_v54, 0.0 }
  0xd1   :  { %v220_v46 = vsel %vm206_vm2, %v198_v42, %v213_v44  ;;  %v216_v2 = vsel %vm202_vm5, %v186_v54, %v209_v63 }
  0xd2   :  { %261 = vmatpush.msra.mxu1 %v220_v46 }
  0xd4   :  { %v188_v49 = vpop.f32.mrf.mxu2  ;;  %262 = vmatpush.msra.mxu1 %v219_v47 }
  0xd5   :  { %v189_v51 = vadd.f32 %v188_v49, %v75_v50 }
  0xd7   :  { %v210_v59 = vmul.f32 0.01, %v189_v51  ;;  %vm203_vm4 = vcmp.ge.f32.partialorder %v189_v51, 0.0 }
  0xd9   :  { %v217_v0 = vsel %vm203_vm4, %v189_v51, %v210_v59 }
  0xdc   :  { %v191_v53 = vpop.f32.mrf.mxu2 }
  0xdd   :  { %v192_v55 = vadd.f32 %v191_v53, %v80_v45 }
  0xdf   :  { %vm204_vm3 = vcmp.ge.f32.partialorder %v192_v55, 0.0  ;;  %v211_v58 = vmul.f32 0.01, %v192_v55 }
  0xe1   :  { %v218_v62 = vsel %vm204_vm3, %v192_v55, %v211_v58 }
  0xe2   :  { %263 = vmatpush.msra.mxu1 %v218_v62 }
  0xe4   :  { %264 = vmatpush.msra.mxu1 %v217_v0 }
  0xe6   :  { %265 = vmatpush.msra.mxu1 %v216_v2 }
  0xe8   :  { %266 = vmatpush.msra.mxu1 %v215_v4 }
  0xea   :  { %267 = vmatpush.msra.mxu1 %v214_v6 }
  0xeb   :  { %373 = vmatmul.msk.f32.vlgmr.msra.gmra.mxu1 %vm242_vm8, %v221_v5 }
  0xf3   :  { %374 = vmatmul.msk.f32.gmra.mxu1 %vm242_vm8, %v222_v7 }
  0xfb   :  { %375 = vmatmul.msk.f32.gmra.mxu1 %vm242_vm8, %v223_v8 }
 0x168   :  { %v269_v9 = vpop.f32.mrf.mxu1 }
 0x169   :  { %v270_v16 = vadd.f32 %v269_v9, %v230_v14 }
 0x16b   :  { %v281_v21 = vmul.f32 0.01, %v270_v16  ;;  %vm278_vm11 = vcmp.ge.f32.partialorder %v270_v16, 0.0 }
 0x16d   :  { %v284_v24 = vsel %vm278_vm11, %v270_v16, %v281_v21 }
 0x170   :  { %v272_v10 = vpop.f32.mrf.mxu1 }
 0x171   :  { %v273_v13 = vadd.f32 %v272_v10, %v235_v11 }
 0x173   :  { %v282_v19 = vmul.f32 0.01, %v273_v13  ;;  %vm279_vm10 = vcmp.ge.f32.partialorder %v273_v13, 0.0 }
 0x175   :  { %v285_v22 = vsel %vm279_vm10, %v273_v13, %v282_v19 }
 0x178   :  { %v275_v15 = vpop.f32.mrf.mxu1 }
 0x179   :  { %v276_v17 = vadd.f32 %v275_v15, %v240_v12 }
 0x17b   :  { %vm280_vm9 = vcmp.ge.f32.partialorder %v276_v17, 0.0  ;;  %v283_v18 = vmul.f32 0.01, %v276_v17 }
 0x17d   :  { %v286_v20 = vsel %vm280_vm9, %v276_v17, %v283_v18 }
 0x17e   :  { %311 = vmatpush.msrb.mxu1 %v286_v20 }
 0x180   :  { %312 = vmatpush.msrb.mxu1 %v285_v22 }
 0x182   :  { %313 = vmatpush.msrb.mxu1 %v284_v24 }
 0x183   :  { %376 = vmatmul.msk.f32.vlgmr.msrb.gmra.mxu1 %vm294_vm12, %v287_v23 }
 0x200   :  { %v315_v26 = vpop.f32.mrf.mxu1 }
 0x201   :  { %v316_v27 = vadd.f32 %v315_v26, %v292_v25 }
 0x203   :  { %v319_v28 = vmin.f32 %v316_v27, 20.0  ;;  %vm318_vm14 = vcmp.gt.f32.partialorder %v316_v27, 20.0 }
 0x205   :  { %v320_v29 = vmul.f32 1.442695, %v319_v28 }
 0x207   :  { %414 = vpow2.f32 %v320_v29 }
 0x20d   :  { %v415_v30 = vpop.eup %414 }
 0x20e   :  { %v322_v31 = vadd.f32 1.0, %v415_v30  ;;  %v325_v32 = vmul.f32 -0.5, %v415_v30  ;;  %v328_v34 = vand.u32 2147483647, %v415_v30 }
 0x210   :  { %416 = vlog2.f32 %v322_v31  ;;  %v326_v33 = vadd.f32 1.0, %v325_v32  ;;  %vm329_vm13 = vcmp.lt.f32.partialorder %v328_v34, 0.0004427343 }
 0x212   :  { %v327_v37 = vmul.f32 %v415_v30, %v326_v33 }
 0x216   :  { %v417_v35 = vpop.eup %416 }
 0x217   :  { %v324_v36 = vmul.f32 0.6931472, %v417_v35 }
 0x219   :  { %v330_v38 = vsel %vm329_vm13, %v327_v37, %v324_v36 }
 0x21a   :  { %v331_v39 = vsel %vm318_vm14, %v316_v27, %v330_v38 }
 0x21b   :  { %v332_v40 = vadd.f32 0.001, %v331_v39 }
 0x21d   :  { %333 = vst [vmem:[#allocation2] sm:$0xf] %v332_v40 }
 0x21e   :  { %344 = dma.vmem_to_hbm [thread:$0]  %s340_s25, 64, %s342_s28, [#allocation3]  }
 0x21f   :  { %442 = dma.done.wait [#allocation3], 64  }
 0x220   :  { %443 = vsyncadd [#allocation3], 4294967232 }
 0x221   :  { %349 = vsyncpa [#allocation3], 1 }

</bundles_post_ra>
